<compile_context>
chip_gen: v5e
topology: v5e:2x2
jax: 0.10.0
libtpu: 0.0.40
codegen_flags: <defaults>
</compile_context>

<pallas_src>
import functools

import jax
import jax.numpy as jnp
from jax.experimental import pallas as pl
from jax.experimental.pallas import tpu as pltpu


def _ce_label_smooth_kernel(x_ref, t_ref, loss_ref, *, epsilon, num_classes):
    """One (Bt, K) row-tile of fused label-smoothed cross entropy.

    x_ref:    (Bt, K) logits        (VMEM, any float dtype)
    t_ref:    (Bt, 1) int32 labels  (VMEM)
    loss_ref: (Bt, 1) f32 per-row loss = (-smoothed_onehot * log_softmax(x)).sum(1)
    """
    x = x_ref[...].astype(jnp.float32)                         # (Bt, K)
    t = t_ref[...]                                             # (Bt, 1) int32

    # Numerically-stable logsumexp pieces over the class (lane) axis.
    m = jnp.max(x, axis=1, keepdims=True)                      # (Bt, 1)  XLU
    z = x - m                                                  # (Bt, K)  VPU
    lse = jnp.log(jnp.sum(jnp.exp(z), axis=1, keepdims=True))  # EUP + XLU

    # Smoothed one-hot weights sum to 1, so the loss collapses to a single
    # weighted class-axis reduction (one XLU pass instead of two):
    #   loss_b = -sum_k w_k * (z_k - lse_b) = lse_b - sum_k w_k * z_k
    class_ids = jax.lax.broadcasted_iota(jnp.int32, x.shape, dimension=1)
    eps_over_k = jnp.float32(epsilon / num_classes)
    w = jnp.where(class_ids == t,
                  eps_over_k + jnp.float32(1.0 - epsilon), eps_over_k)
    loss_ref[...] = lse - jnp.sum(w * z, axis=1, keepdims=True)


# Upper bound on simultaneously-live f32 (Bt, K) intermediates in the kernel
# (x_f32, z, exp(z), w, w*z).
_F32_INTERMEDIATES = 5


def _tpu_vmem_capacity_bytes(default=64 * 1024 * 1024):
    """Per-core VMEM capacity; default to the smallest current gen (v7x)."""
    try:
        cap = getattr(pltpu.get_tpu_info(), "vmem_capacity_bytes", None)
        if cap:
            return int(cap)
    except Exception:
        pass
    return default


def _choose_row_tile(batch, num_classes, in_dtype_bytes, vmem_budget):
    """Largest multiple-of-8 row tile whose working set fits `vmem_budget`.

    Per-row footprint ~= double-buffered input tile (2 * K * in_bytes) plus
    ~5 f32 (Bt, K) compute intermediates.  No artificial cap: per-grid-step
    overhead (~0.35 us) is amortized by making the tile as big as VMEM allows.
    """
    per_row = num_classes * (2 * in_dtype_bytes + _F32_INTERMEDIATES * 4)
    max_rows = max(8, (vmem_budget // per_row) // 8 * 8)
    if batch <= max_rows:
        return batch  # full batch in one block (always a legal block shape)
    # Prefer a tile that divides B (no padded tail block), as long as it
    # stays within ~3/4 of the budgeted size.
    for bt in range(max_rows, (3 * max_rows) // 4, -8):
        if batch % bt == 0:
            return bt
    return max_rows


def cross_entropy_label_smooth(inputs, targets, *, epsilon=0.1, reduce=True,
                               row_tile=None):
    """inputs: (B, K) float logits; targets: (B,) int labels.

    reduce=True  -> scalar f32 loss  ( == (-smoothed * log_softmax).mean(0).sum() )
    reduce=False -> (B,) f32 per-sample loss ( == (-smoothed * log_softmax).sum(1) )
    """
    B, K = inputs.shape
    targets_2d = targets.astype(jnp.int32).reshape(B, 1)

    in_bytes = jnp.dtype(inputs.dtype).itemsize
    vmem_cap = _tpu_vmem_capacity_bytes()
    vmem_budget = (2 * vmem_cap) // 5    # ~40% of physical for the tile estimate
    vmem_limit = (3 * vmem_cap) // 4     # scoped limit handed to Mosaic

    bt = row_tile if row_tile is not None else _choose_row_tile(
        B, K, in_bytes, vmem_budget)
    grid = (pl.cdiv(B, bt),)

    kernel = functools.partial(
        _ce_label_smooth_kernel, epsilon=float(epsilon), num_classes=int(K))

    cost = pl.CostEstimate(
        flops=5 * B * K,                          # max/sub/mul/select/sum
        transcendentals=B * K,                    # exp (plus B logs, negligible)
        bytes_accessed=B * K * in_bytes + 2 * B * 4,
    )

    per_row = pl.pallas_call(
        kernel,
        out_shape=jax.ShapeDtypeStruct((B, 1), jnp.float32),
        grid=grid,
        in_specs=[
            pl.BlockSpec((bt, K), lambda i: (i, 0)),   # logits row tile
            pl.BlockSpec((bt, 1), lambda i: (i, 0)),   # matching label tile
        ],
        out_specs=pl.BlockSpec((bt, 1), lambda i: (i, 0)),  # per-row losses
        compiler_params=pltpu.CompilerParams(
            dimension_semantics=("parallel",),  # shard row blocks across TCs (v7x)
            vmem_limit_bytes=int(vmem_limit),
        ),
        cost_estimate=cost,
    )(inputs, targets_2d)

    if reduce:
        # (-smoothed * log_probs).mean(0).sum() == mean over B of per-row losses.
        # TODO(synk): for very small B, fold this mean into the kernel epilogue
        # (SMEM accumulator + pl.when on last step); kept outside so the batch
        # grid axis stays "parallel" for dual-TC sharding on v7x.
        return jnp.mean(per_row)
    return per_row[:, 0]


def _reference(inputs, targets, epsilon=0.1, reduce=True):
    """Pure-JAX reference mirroring the PyTorch forward."""
    B, K = inputs.shape
    log_probs = jax.nn.log_softmax(inputs.astype(jnp.float32), axis=1)
    one_hot = jax.nn.one_hot(targets, K, dtype=jnp.float32)
    smoothed = (1.0 - epsilon) * one_hot + epsilon / K
    if reduce:
        return jnp.sum(jnp.mean(-smoothed * log_probs, axis=0))
    return jnp.sum(-smoothed * log_probs, axis=1)


if __name__ == "__main__":
    key = jax.random.PRNGKey(0)
    k1, k2, k3, k4, k5, k6 = jax.random.split(key, 6)

    batch, num_classes = 24, 128  # small, tile-friendly (sublane=8, lane=128)
    logits = jax.random.normal(k1, (batch, num_classes), dtype=jnp.float32)
    labels = jax.random.randint(k2, (batch,), 0, num_classes, dtype=jnp.int32)

    # 1) Default auto tile (single block here), reduce=True.
    loss = jax.block_until_ready(
        cross_entropy_label_smooth(logits, labels, epsilon=0.1))
    ref = _reference(logits, labels, epsilon=0.1)
    assert jnp.allclose(loss, ref, atol=1e-5, rtol=1e-5), (loss, ref)

    # 2) Force a small row tile to exercise the multi-block grid + pipelining.
    loss_tiled = jax.block_until_ready(
        cross_entropy_label_smooth(logits, labels, epsilon=0.1, row_tile=8))
    assert jnp.allclose(loss_tiled, ref, atol=1e-5, rtol=1e-5), (loss_tiled, ref)

    # 3) reduce=False per-sample path.
    per_sample = jax.block_until_ready(
        cross_entropy_label_smooth(logits, labels, epsilon=0.1, reduce=False,
                                   row_tile=8))
    ref_ps = _reference(logits, labels, epsilon=0.1, reduce=False)
    assert jnp.allclose(per_sample, ref_ps, atol=1e-5, rtol=1e-5)

    # 4) bf16 logits stay bf16 in HBM; cast happens in-kernel.
    logits_bf16 = logits.astype(jnp.bfloat16)
    loss_bf16 = jax.block_until_ready(
        cross_entropy_label_smooth(logits_bf16, labels, epsilon=0.1))
    ref_bf16 = _reference(logits_bf16, labels, epsilon=0.1)
    assert jnp.allclose(loss_bf16, ref_bf16, atol=1e-4, rtol=1e-4), (loss_bf16, ref_bf16)

    # 5) Ragged batch (B % row_tile != 0): padded tail block, masked stores.
    b_rag = 20
    logits_rag = jax.random.normal(k3, (b_rag, num_classes), dtype=jnp.float32)
    labels_rag = jax.random.randint(k4, (b_rag,), 0, num_classes, dtype=jnp.int32)
    loss_rag = jax.block_until_ready(
        cross_entropy_label_smooth(logits_rag, labels_rag, epsilon=0.1,
                                   row_tile=8))
    ref_rag = _reference(logits_rag, labels_rag, epsilon=0.1)
    assert jnp.allclose(loss_rag, ref_rag, atol=1e-5, rtol=1e-5), (loss_rag, ref_rag)

    # 6) K not a multiple of 128: lane-masked class-axis reductions.
    b_odd, k_odd = 16, 1000
    logits_odd = jax.random.normal(k5, (b_odd, k_odd), dtype=jnp.float32)
    labels_odd = jax.random.randint(k6, (b_odd,), 0, k_odd, dtype=jnp.int32)
    loss_odd = jax.block_until_ready(
        cross_entropy_label_smooth(logits_odd, labels_odd, epsilon=0.1))
    ref_odd = _reference(logits_odd, labels_odd, epsilon=0.1)
    assert jnp.allclose(loss_odd, ref_odd, atol=1e-5, rtol=1e-5), (loss_odd, ref_odd)

    print("KERNEL_OK")
</pallas_src>

<mosaic_0001>
module attributes {stable_mosaic.version = 11 : i64} {
  func.func @_ce_label_smooth_kernel(%arg0: i32, %arg1: memref<24x128xf32, #tpu.memory_space<vmem>>, %arg2: memref<24x1xi32, #tpu.memory_space<vmem>>, %arg3: memref<24x1xf32, #tpu.memory_space<vmem>>) attributes {dimension_semantics = [#tpu.dimension_semantics<parallel>], iteration_bounds = array<i64: 1>, scalar_prefetch = 0 : i64, scratch_operands = 0 : i64, tpu.core_type = #tpu.core_type<tc>, window_params = [{transform_indices = @transform_0, window_bounds = array<i64: 24, 128>}, {transform_indices = @transform_1, window_bounds = array<i64: 24, 1>}, {transform_indices = @transform_2, window_bounds = array<i64: 24, 1>}]} {
    %c0 = arith.constant 0 : index
    %c0_0 = arith.constant 0 : index
    %0 = vector.load %arg1[%c0, %c0_0] : memref<24x128xf32, #tpu.memory_space<vmem>>, vector<24x128xf32>
    %c0_1 = arith.constant 0 : index
    %c0_2 = arith.constant 0 : index
    %1 = vector.load %arg2[%c0_1, %c0_2] : memref<24x1xi32, #tpu.memory_space<vmem>>, vector<24x1xi32>
    %cst = arith.constant dense<0xFF800000> : vector<24xf32>
    %2 = vector.multi_reduction <maximumf>, %0, %cst [1] : vector<24x128xf32> to vector<24xf32>
    %3 = vector.shape_cast %2 : vector<24xf32> to vector<24x1xf32>
    %4 = vector.broadcast %3 : vector<24x1xf32> to vector<24x128xf32>
    %5 = arith.subf %0, %4 : vector<24x128xf32>
    %6 = math.exp %5 : vector<24x128xf32>
    %cst_3 = arith.constant dense<0.000000e+00> : vector<24xf32>
    %7 = vector.multi_reduction <add>, %6, %cst_3 [1] : vector<24x128xf32> to vector<24xf32>
    %8 = vector.shape_cast %7 : vector<24xf32> to vector<24x1xf32>
    %9 = math.log %8 : vector<24x1xf32>
    %10 = tpu.iota {dimensions = array<i32: 1>} : vector<24x128xi32>
    %11 = vector.broadcast %1 : vector<24x1xi32> to vector<24x128xi32>
    %12 = arith.cmpi eq, %10, %11 : vector<24x128xi32>
    %cst_4 = arith.constant 7.812500e-04 : f32
    %cst_5 = arith.constant 0.899999976 : f32
    %13 = arith.addf %cst_4, %cst_5 : f32
    %cst_6 = arith.constant 7.812500e-04 : f32
    %14 = vector.broadcast %13 : f32 to vector<24x128xf32>
    %15 = vector.broadcast %cst_6 : f32 to vector<24x128xf32>
    %16 = arith.select %12, %14, %15 : vector<24x128xi1>, vector<24x128xf32>
    %17 = arith.mulf %16, %5 : vector<24x128xf32>
    %cst_7 = arith.constant dense<0.000000e+00> : vector<24xf32>
    %18 = vector.multi_reduction <add>, %17, %cst_7 [1] : vector<24x128xf32> to vector<24xf32>
    %19 = vector.shape_cast %18 : vector<24xf32> to vector<24x1xf32>
    %20 = arith.subf %9, %19 : vector<24x1xf32>
    %c0_8 = arith.constant 0 : index
    %c0_9 = arith.constant 0 : index
    %21 = vector.load %arg3[%c0_8, %c0_9] : memref<24x1xf32, #tpu.memory_space<vmem>>, vector<24x1xf32>
    tpu.vector_store %arg3[%c0_8, %c0_9], %20 {strides = array<i32>} : memref<24x1xf32, #tpu.memory_space<vmem>>, vector<24x1xf32>,
    return
  }
  func.func @transform_0(%arg0: i32) -> (i32, i32) {
    %c0_i32 = arith.constant 0 : i32
    %c0_i32_0 = arith.constant 0 : i32
    return %arg0, %c0_i32 : i32, i32
  }
  func.func @transform_1(%arg0: i32) -> (i32, i32) {
    %c0_i32 = arith.constant 0 : i32
    %c0_i32_0 = arith.constant 0 : i32
    return %arg0, %c0_i32 : i32, i32
  }
  func.func @transform_2(%arg0: i32) -> (i32, i32) {
    %c0_i32 = arith.constant 0 : i32
    %c0_i32_0 = arith.constant 0 : i32
    return %arg0, %c0_i32 : i32, i32
  }
}

</mosaic_0001>

<bundles_post_ra>
// kernel: tpu_custom_call.1
= control target key start
LH: loop header
LB: loop body
LE: loop exit
PB: predicated region body
PF: predicated region fallthrough
CT: control target
= control target key end

     0   :  { %v98_v2 = vmov 0   ;;  %v44_v7 = vlaneseq  ;;  %v99_v15 = vmov 0.00078125   ;;  %vm73_vm3 = vcmask 7168   ;;  %s142_s0 = inlined_call_operand.vmem [shape: f32[24,128], index: 0, kind: input, shape index: {}]   ;;  %s143_s1 = inlined_call_operand.vmem [shape: s32[24,1], index: 1, kind: input, shape index: {}]   ;;  %s144_s2 = inlined_call_operand.vmem [shape: f32[24,1], index: 2, kind: output, shape index: {}]  }
   0x1   :  { %v13_v0 = vld [vmem:[%s142_s0 + $0x10] sm:$0xff]  ;;  %v11_v1 = vld [vmem:[%s142_s0] sm:$0xff]  ;;  %84 = vset.pattern.permute.xlu2 %v98_v2  ;;  %83 = vset.pattern.permute.xlu1 %v98_v2  ;;  %v15_v3 = vld [vmem:[%s143_s1 + $0x8] sm:$0xff] }
   0x2   :  { %21 = vmax.xlane.f32.xlu1 %v13_v0  ;;  %17 = vmax.xlane.f32.xlu0 %v11_v1  ;;  %v12_v4 = vld [vmem:[%s142_s0 + $0x8] sm:$0xff]  ;;  %v16_v5 = vld [vmem:[%s143_s1 + $0x10] sm:$0xff]  ;;  %v14_v6 = vld [vmem:[%s143_s1] sm:$0xff]  ;;  %v45_v10 = vand.u32 127, %v44_v7 }
   0x3   :  { %50 = vperm.xlu2 %84, %v15_v3   ;;  %85 = vset.pattern.permute.xlu0 %v98_v2 }
   0xa   :  { %19 = vmax.xlane.f32.xlu0 %v12_v4 }
   0xb   :  { %53 = vperm.xlu2 %84, %v16_v5  }
  0x1b   :  { %47 = vperm.xlu1 %83, %v14_v6  }
  0x5d   :  { %v51_v13 = vpop.permute.xlu2 %50 }
  0x5e   :  { %vm56_vm0 = vcmp.eq.s32.totalorder %v45_v10, %v51_v13 }
  0x5f   :  { %v59_v16 = vsel %vm56_vm0, 0.9007812, %v99_v15 }
  0x65   :  { %v54_v26 = vpop.permute.xlu2 %53 }
  0x66   :  { %vm57_vm2 = vcmp.eq.s32.totalorder %v45_v10, %v54_v26 }
  0x67   :  { %v60_v29 = vsel %vm57_vm2, 0.9007812, %v99_v15 }
  0x75   :  { %v18_v8 = vpop.xlane.xlu0 %17  ;;  %v22_v11 = vpop.xlane.xlu1 %21 }
  0x76   :  { %v23_v9 = vsub.f32 %v11_v1, %v18_v8  ;;  %v25_v14 = vsub.f32 %v13_v0, %v22_v11 }
  0x78   :  { %v26_v12 = vmul.f32 1.442695, %v23_v9  ;;  %v30_v19 = vmul.f32 1.442695, %v25_v14  ;;  %v63_v30 = vmul.f32 %v60_v29, %v25_v14 }
  0x7a   :  { %86 = vpow2.f32 %v26_v12 }
  0x7d   :  { %v20_v17 = vpop.xlane.xlu0 %19 }
  0x7e   :  { %v24_v18 = vsub.f32 %v12_v4, %v20_v17 }
  0x80   :  { %v28_v20 = vmul.f32 1.442695, %v24_v18  ;;  %v62_v21 = vmul.f32 %v59_v16, %v24_v18  ;;  %v87_v22 = vpop.eup %86 }
  0x81   :  { %32 = vadd.xlane.f32.xlu0 %v87_v22 }
  0x82   :  { %88 = vpow2.f32 %v28_v20  ;;  %66 = vadd.xlane.f32.xlu1 %v62_v21 }
  0x83   :  { %90 = vpow2.f32 %v30_v19 }
  0x88   :  { %v89_v23 = vpop.eup %88 }
  0x89   :  { %v91_v24 = vpop.eup %90  ;;  %34 = vadd.xlane.f32.xlu2 %v89_v23 }
  0x8a   :  { %36 = vadd.xlane.f32.xlu0 %v91_v24 }
  0x8d   :  { %v48_v25 = vpop.permute.xlu1 %47 }
  0x8e   :  { %vm55_vm1 = vcmp.eq.s32.totalorder %v45_v10, %v48_v25 }
  0x8f   :  { %v58_v27 = vsel %vm55_vm1, 0.9007812, %v99_v15 }
  0x90   :  { %v61_v28 = vmul.f32 %v58_v27, %v23_v9 }
  0x92   :  { %64 = vadd.xlane.f32.xlu0 %v61_v28 }
  0x9a   :  { %68 = vadd.xlane.f32.xlu0 %v63_v30 }
  0xf4   :  { %v33_v31 = vpop.xlane.xlu0 %32 }
  0xf5   :  { %92 = vlog2.f32 %v33_v31  ;;  %v67_v38 = vpop.xlane.xlu1 %66 }
  0xfb   :  { %v93_v34 = vpop.eup %92 }
  0xfc   :  { %v35_v32 = vpop.xlane.xlu2 %34  ;;  %v39_v36 = vmul.f32 0.6931472, %v93_v34 }
  0xfd   :  { %94 = vlog2.f32 %v35_v32  ;;  %v37_v33 = vpop.xlane.xlu0 %36 }
  0xfe   :  { %96 = vlog2.f32 %v37_v33 }
 0x103   :  { %v95_v35 = vpop.eup %94 }
 0x104   :  { %v41_v37 = vmul.f32 0.6931472, %v95_v35  ;;  %v97_v42 = vpop.eup %96 }
 0x105   :  { %v65_v39 = vpop.xlane.xlu0 %64  ;;  %v43_v43 = vmul.f32 0.6931472, %v97_v42 }
 0x106   :  { %v71_v40 = vsub.f32 %v41_v37, %v67_v38  ;;  %v70_v41 = vsub.f32 %v39_v36, %v65_v39 }
 0x108   :  { %75 = vst.msk [vmem:[%s144_s2 + $0x8] sm:$0xff] %vm73_vm3, %v71_v40 }
 0x109   :  { %74 = vst.msk [vmem:[%s144_s2] sm:$0xff] %vm73_vm3, %v70_v41 }
 0x10d   :  { %v69_v44 = vpop.xlane.xlu0 %68 }
 0x10e   :  { %v72_v45 = vsub.f32 %v43_v43, %v69_v44 }
 0x110   :  { %76 = vst.msk [vmem:[%s144_s2 + $0x10] sm:$0xff] %vm73_vm3, %v72_v45 }

</bundles_post_ra>
